<compile_context>
chip_gen: v5e
topology: v5e:2x2
jax: 0.10.0
libtpu: 0.0.40
codegen_flags: <defaults>
</compile_context>

<pallas_src>
import jax
import jax.numpy as jnp
from jax import lax
from jax.experimental import pallas as pl
from jax.experimental.pallas import tpu as pltpu


def _head_kernel(x_ref, wt_ref, b_ref, o_ref):
    """One-shot: logits = x @ w_t.T + b (f32 accumulate), then log-softmax."""
    # In-kernel cast (no-op if x already arrives bf16); MXU-native operands.
    x = x_ref[...].astype(jnp.bfloat16)                       # (B, K)
    # Contract over the last dim of both operands: (B, K) . (C, K) -> (B, C).
    logits = lax.dot_general(
        x, wt_ref[...],
        dimension_numbers=(((1,), (1,)), ((), ())),
        preferred_element_type=jnp.float32,
    )
    logits = logits + b_ref[...]                              # bias (1, C) f32
    m = jnp.max(logits, axis=-1, keepdims=True)
    lse = m + jnp.log(jnp.sum(jnp.exp(logits - m), axis=-1, keepdims=True))
    o_ref[...] = (logits - lse).astype(o_ref.dtype)


def prepare_head_params(weight_ck, bias):
    """One-time (parameter-load) conversion to kernel dtypes / layouts.

    weight_ck: (C, K) — PyTorch nn.Linear storage layout (out_features,
               in_features), which is already the lane-dense layout the
               kernel wants (no transpose needed).
    bias:      (C,)
    """
    c = bias.shape[0]
    return (weight_ck.astype(jnp.bfloat16),
            bias.astype(jnp.float32).reshape(1, c))


@jax.jit
def glibert_classifier_ffnn_head(hidden_state, weight_ck_bf16, bias_row_f32):
    """hidden_state: (B, L, H); weight_ck_bf16: (C, L*H) bf16; bias_row_f32: (1, C) f32.

    Returns log-probabilities (B, C) f32, matching
    LogSoftmax(Linear(reshape(hidden_state, (B, L*H)))).
    """
    B, L, H = hidden_state.shape
    C, K = weight_ck_bf16.shape
    assert K == L * H

    # Flatten only; the dtype cast happens inside the kernel.
    x = hidden_state.reshape(B, K)

    return pl.pallas_call(
        _head_kernel,
        out_shape=jax.ShapeDtypeStruct((B, C), jnp.float32),
        in_specs=[
            pl.BlockSpec(memory_space=pltpu.MemorySpace.VMEM),  # activations (B, K)
            pl.BlockSpec(memory_space=pltpu.MemorySpace.VMEM),  # weight (C, K) bf16
            pl.BlockSpec(memory_space=pltpu.MemorySpace.VMEM),  # bias (1, C) f32
        ],
        out_specs=pl.BlockSpec(memory_space=pltpu.MemorySpace.VMEM),
        cost_estimate=pl.CostEstimate(
            flops=2 * B * K * C,
            bytes_accessed=(B * K + C * K) * 2 + (B * C + C) * 4,
            transcendentals=B * C,
        ),
    )(x, weight_ck_bf16, bias_row_f32)


if __name__ == "__main__":
    # Small shapes consistent with the module: BERT hidden = 768, short seq.
    B, L, H = 2, 8, 768          # batch, max_len, BERT hidden size
    NUM_CLASSES = 6
    K = L * H

    key = jax.random.PRNGKey(0)
    k_x, k_w, k_b = jax.random.split(key, 3)

    # Activations as the TPU model would hold them (bf16 storage).
    hidden_state = jax.random.normal(k_x, (B, L, H), jnp.float32).astype(
        jnp.bfloat16
    )
    # PyTorch nn.Linear weight layout: (out_features, in_features) = (C, K).
    weight_ck = jax.random.normal(k_w, (NUM_CLASSES, K), jnp.float32) * 0.02
    bias = jax.random.normal(k_b, (NUM_CLASSES,), jnp.float32) * 0.02

    # One-time parameter preparation — OFF the per-call hot path.
    w_bf16, b_row = prepare_head_params(weight_ck, bias)

    out = glibert_classifier_ffnn_head(hidden_state, w_bf16, b_row)
    out = jax.block_until_ready(out)

    # Pure-JAX reference of the same forward semantics (same bf16 weight fed
    # to both paths; f32 math).
    ref = jax.nn.log_softmax(
        hidden_state.astype(jnp.float32).reshape(B, K)
        @ w_bf16.astype(jnp.float32).T
        + bias,
        axis=-1,
    )
    assert out.shape == (B, NUM_CLASSES)
    assert jnp.allclose(out, ref, atol=2e-3, rtol=2e-3), "mismatch vs reference"
    print("KERNEL_OK")
</pallas_src>

<mosaic_0001>
module attributes {stable_mosaic.version = 11 : i64} {
  func.func @_head_kernel(%arg0: memref<2x6144xbf16, #tpu.memory_space<vmem>>, %arg1: memref<6x6144xbf16, #tpu.memory_space<vmem>>, %arg2: memref<1x6xf32, #tpu.memory_space<vmem>>, %arg3: memref<2x6xf32, #tpu.memory_space<vmem>>) attributes {dimension_semantics = [], scalar_prefetch = 0 : i64, scratch_operands = 0 : i64, tpu.core_type = #tpu.core_type<tc>} {
    %c0 = arith.constant 0 : index
    %c0_0 = arith.constant 0 : index
    %0 = vector.load %arg0[%c0, %c0_0] : memref<2x6144xbf16, #tpu.memory_space<vmem>>, vector<2x6144xbf16>
    %c0_1 = arith.constant 0 : index
    %c0_2 = arith.constant 0 : index
    %1 = vector.load %arg1[%c0_1, %c0_2] : memref<6x6144xbf16, #tpu.memory_space<vmem>>, vector<6x6144xbf16>
    %cst = arith.constant dense<0.000000e+00> : vector<2x6xf32>
    %2 = tpu.matmul %0, %1, %cst {dimension_numbers = #tpu.dot_dimension_numbers<[1], [1], [0], [0], [0, 0, 1, 0], [], []>} : vector<2x6144xbf16>, vector<6x6144xbf16>, vector<2x6xf32> -> vector<2x6xf32>
    %c0_3 = arith.constant 0 : index
    %c0_4 = arith.constant 0 : index
    %3 = vector.load %arg2[%c0_3, %c0_4] : memref<1x6xf32, #tpu.memory_space<vmem>>, vector<1x6xf32>
    %4 = vector.broadcast %3 : vector<1x6xf32> to vector<2x6xf32>
    %5 = arith.addf %2, %4 : vector<2x6xf32>
    %cst_5 = arith.constant dense<0xFF800000> : vector<2xf32>
    %6 = vector.multi_reduction <maximumf>, %5, %cst_5 [1] : vector<2x6xf32> to vector<2xf32>
    %7 = vector.shape_cast %6 : vector<2xf32> to vector<2x1xf32>
    %8 = vector.broadcast %7 : vector<2x1xf32> to vector<2x6xf32>
    %9 = arith.subf %5, %8 : vector<2x6xf32>
    %10 = math.exp %9 : vector<2x6xf32>
    %cst_6 = arith.constant dense<0.000000e+00> : vector<2xf32>
    %11 = vector.multi_reduction <add>, %10, %cst_6 [1] : vector<2x6xf32> to vector<2xf32>
    %12 = vector.shape_cast %11 : vector<2xf32> to vector<2x1xf32>
    %13 = math.log %12 : vector<2x1xf32>
    %14 = arith.addf %7, %13 : vector<2x1xf32>
    %15 = vector.broadcast %14 : vector<2x1xf32> to vector<2x6xf32>
    %16 = arith.subf %5, %15 : vector<2x6xf32>
    %c0_7 = arith.constant 0 : index
    %c0_8 = arith.constant 0 : index
    %17 = vector.load %arg3[%c0_7, %c0_8] : memref<2x6xf32, #tpu.memory_space<vmem>>, vector<2x6xf32>
    tpu.vector_store %arg3[%c0_7, %c0_8], %16 {strides = array<i32>} : memref<2x6xf32, #tpu.memory_space<vmem>>, vector<2x6xf32>,
    return
  }
}

</mosaic_0001>

<bundles_post_ra>
// kernel: glibert_classifier_ffnn_head.1
= control target key start
LH: loop header
LB: loop body
LE: loop exit
PB: predicated region body
PF: predicated region fallthrough
CT: control target
= control target key end

     0   :  { %8 = vsyncpa [#allocation3], 0  ;;  %s1107_s0 = inlined_call_operand.vmem [shape: bf16[2,6144], index: 0, kind: input, shape index: {}]   ;;  %s1108_s1 = inlined_call_operand.hbm [shape: bf16[6,6144], index: 1, kind: input, shape index: {}]   ;;  %s1109_s2 = inlined_call_operand.vmem [shape: f32[1,6], index: 2, kind: input, shape index: {}]   ;;  %s1110_s3 = inlined_call_operand.hbm [shape: f32[2,6], index: 3, kind: output, shape index: {}]  }
   0x1   :  { %9 = vsyncpa [#allocation4], 0  ;;  %s17_s14 = sshll.u32 %s1108_s1, 4  ;;  %s1055_s15 = smov [#allocation2]   ;;  %s18_s14 = int_to_ptr.hbm [resolvable:$true] %s17_s14 }
   0x2   :  { %s19_s16 = sshll.u32 %s1055_s15, 4  ;;  %s20_s16 = int_to_ptr.vmem [resolvable:$true] %s19_s16 }
   0x3   :  { %22 = dma.hbm_to_vmem [thread:$0]  %s18_s14, 3072, %s20_s16, [#allocation3]  }
   0x4   :  { %1051 = dma.done.wait [#allocation3], 3072  }
   0x5   :  { %1052 = vsyncadd [#allocation3], 4294964224  ;;  %v36_v0 = vld [vmem:[#allocation2] sm:$0x77]  ;;  %v37_v1 = vld [vmem:[#allocation2 + $0x8] sm:$0x77] }
   0x6   :  { %v30_v2 = vld [vmem:[%s1107_s0] sm:$0xff]  ;;  %v196_v3 = vunpack.c.l.b16 %v36_v0  ;;  %v197_v4 = vunpack.c.h.b16 %v36_v0  ;;  %v198_v5 = vunpack.c.l.b16 %v37_v1  ;;  %v199_v6 = vunpack.c.h.b16 %v37_v1  ;;  %v38_v8 = vld [vmem:[#allocation2 + $0x10] sm:$0x77]  ;;  %v41_v17 = vld [vmem:[#allocation2 + $0x28] sm:$0x77]  ;;  %s986_s5 = sshll.u32 %s1110_s3, 4  ;;  %s987_s5 = int_to_ptr.hbm [resolvable:$true] %s986_s5 }
   0x7   :  { %65 = vst [vmem:[#allocation1] ss:$9 sm:$0xff] %v30_v2  ;;  %v39_v7 = vld [vmem:[#allocation2 + $0x18] sm:$0x77]  ;;  %v200_v10 = vunpack.c.l.b16 %v38_v8  ;;  %v201_v12 = vunpack.c.h.b16 %v38_v8  ;;  %v40_v18 = vld [vmem:[#allocation2 + $0x20] sm:$0x77]  ;;  %v206_v23 = vunpack.c.l.b16 %v41_v17  ;;  %v207_v25 = vunpack.c.h.b16 %v41_v17 }
   0x8   :  { %v202_v9 = vunpack.c.l.b16 %v39_v7  ;;  %v203_v11 = vunpack.c.h.b16 %v39_v7  ;;  %v244_v13 = vpack.c.b16 %v196_v3, %v196_v3  ;;  %v245_v14 = vpack.c.b16 %v197_v4, %v197_v4  ;;  %v31_v29 = vld [vmem:[%s1107_s0 + $0x8] sm:$0xff]  ;;  %v43_v40 = vld [vmem:[#allocation2 + $0x38] sm:$0x77]  ;;  %v42_v41 = vld [vmem:[#allocation2 + $0x30] sm:$0x77] }
   0x9   :  { %v246_v15 = vpack.c.b16 %v198_v5, %v198_v5  ;;  %v247_v16 = vpack.c.b16 %v199_v6, %v199_v6  ;;  %v248_v20 = vpack.c.b16 %v200_v10, %v200_v10  ;;  %v249_v22 = vpack.c.b16 %v201_v12, %v201_v12  ;;  %v32_v58 = vld [vmem:[%s1107_s0 + $0x10] sm:$0xff]  ;;  %v44_v60 = vld [vmem:[#allocation2 + $0x40] sm:$0x77]  ;;  %v47_v5 = vld [vmem:[#allocation2 + $0x58] sm:$0x77] }
   0xa   :  { %v250_v19 = vpack.c.b16 %v202_v9, %v202_v9  ;;  %v251_v21 = vpack.c.b16 %v203_v11, %v203_v11  ;;  %347 = vmatpush.bf16.xpose.msra.mxu0 %v244_v13  ;;  %360 = vmatpush.bf16.xpose.msra.mxu1 %v245_v14  ;;  %v204_v24 = vunpack.c.l.b16 %v40_v18  ;;  %v205_v26 = vunpack.c.h.b16 %v40_v18  ;;  %v45_v59 = vld [vmem:[#allocation2 + $0x48] sm:$0x77]  ;;  %v46_v6 = vld [vmem:[#allocation2 + $0x50] sm:$0x77] }
   0xb   :  { %373 = vmatpush.bf16.xpose.msra.mxu2 %v246_v15  ;;  %386 = vmatpush.bf16.xpose.msra.mxu3 %v247_v16  ;;  %v254_v36 = vpack.c.b16 %v206_v23, %v206_v23  ;;  %v255_v38 = vpack.c.b16 %v207_v25, %v207_v25  ;;  %v210_v42 = vunpack.c.l.b16 %v43_v40  ;;  %v208_v43 = vunpack.c.l.b16 %v42_v41  ;;  %v33_v23 = vld [vmem:[%s1107_s0 + $0x18] sm:$0xff]  ;;  %v48_v25 = vld [vmem:[#allocation2 + $0x60] sm:$0x77] }
   0xc   :  { %v252_v37 = vpack.c.b16 %v204_v24, %v204_v24  ;;  %v253_v39 = vpack.c.b16 %v205_v26, %v205_v26  ;;  %v211_v44 = vunpack.c.h.b16 %v43_v40  ;;  %v209_v45 = vunpack.c.h.b16 %v42_v41  ;;  %v49_v24 = vld [vmem:[#allocation2 + $0x68] sm:$0x77] }
   0xd   :  { %v258_v46 = vpack.c.b16 %v210_v42, %v210_v42  ;;  %v256_v47 = vpack.c.b16 %v208_v43, %v208_v43  ;;  %v214_v61 = vunpack.c.l.b16 %v45_v59  ;;  %v212_v62 = vunpack.c.l.b16 %v44_v60 }
   0xe   :  { %v66_v27 = vld [vmem:[#allocation1] sm:$0xff]  ;;  %v67_v28 = vld [vmem:[#allocation1 + $0x9] sm:$0xff]  ;;  %v68_v30 = vld [vmem:[#allocation1 + $0x12] sm:$0xff]  ;;  %v259_v51 = vpack.c.b16 %v211_v44, %v211_v44  ;;  %v257_v52 = vpack.c.b16 %v209_v45, %v209_v45  ;;  %v215_v63 = vunpack.c.h.b16 %v45_v59  ;;  %v213_v0 = vunpack.c.h.b16 %v44_v60 }
   0xf   :  { %v69_v31 = vld [vmem:[#allocation1 + $0x1b] sm:$0xff]  ;;  %v70_v32 = vld [vmem:[#allocation1 + $0x24] sm:$0xff]  ;;  %v71_v33 = vld [vmem:[#allocation1 + $0x2d] sm:$0xff]  ;;  %v262_v1 = vpack.c.b16 %v214_v61, %v214_v61  ;;  %v260_v2 = vpack.c.b16 %v212_v62, %v212_v62  ;;  %v218_v7 = vunpack.c.l.b16 %v47_v5  ;;  %v216_v8 = vunpack.c.l.b16 %v46_v6 }
  0x10   :  { %v72_v34 = vld [vmem:[#allocation1 + $0x36] sm:$0xff]  ;;  %v73_v35 = vld [vmem:[#allocation1 + $0x3f] sm:$0xff]  ;;  %v263_v3 = vpack.c.b16 %v215_v63, %v215_v63  ;;  %v261_v4 = vpack.c.b16 %v213_v0, %v213_v0  ;;  %v219_v9 = vunpack.c.h.b16 %v47_v5  ;;  %v217_v10 = vunpack.c.h.b16 %v46_v6 }
  0x11   :  { %75 = vst [vmem:[#allocation1] ss:$9 sm:$0xff] %v31_v29  ;;  %348 = vmatmul.bf16.vlgmr.msra.gmra.mxu0 %v66_v27  ;;  %361 = vmatmul.bf16.vlgmr.msra.gmra.mxu1 %v67_v28  ;;  %v266_v11 = vpack.c.b16 %v218_v7, %v218_v7  ;;  %v264_v12 = vpack.c.b16 %v216_v8, %v216_v8  ;;  %v222_v26 = vunpack.c.l.b16 %v49_v24  ;;  %v220_v27 = vunpack.c.l.b16 %v48_v25  ;;  %v55_v63 = vld [vmem:[#allocation2 + $0x98] sm:$0x77]  ;;  %v54_v0 = vld [vmem:[#allocation2 + $0x90] sm:$0x77] }
  0x12   :  { %399 = vmatpush.bf16.xpose.msrb.mxu0 %v248_v20  ;;  %412 = vmatpush.bf16.xpose.msrb.mxu1 %v249_v22  ;;  %v267_v16 = vpack.c.b16 %v219_v9, %v219_v9  ;;  %v265_v17 = vpack.c.b16 %v217_v10, %v217_v10  ;;  %v223_v28 = vunpack.c.h.b16 %v49_v24  ;;  %v221_v29 = vunpack.c.h.b16 %v48_v25 }
  0x13   :  { %425 = vmatpush.bf16.xpose.msrb.mxu2 %v250_v19  ;;  %438 = vmatpush.bf16.xpose.msrb.mxu3 %v251_v21  ;;  %vm964_vm0 = vcmask 41984  }
  0x14   :  { %374 = vmatmul.bf16.vlgmr.msra.gmra.mxu2 %v68_v30  ;;  %387 = vmatmul.bf16.vlgmr.msra.gmra.mxu3 %v69_v31  ;;  %v270_v30 = vpack.c.b16 %v222_v26, %v222_v26  ;;  %v268_v31 = vpack.c.b16 %v220_v27, %v220_v27 }
  0x18   :  { %v76_v48 = vld [vmem:[#allocation1] sm:$0xff]  ;;  %v77_v49 = vld [vmem:[#allocation1 + $0x9] sm:$0xff]  ;;  %v78_v50 = vld [vmem:[#allocation1 + $0x12] sm:$0xff] }
  0x19   :  { %v79_v53 = vld [vmem:[#allocation1 + $0x1b] sm:$0xff]  ;;  %v80_v54 = vld [vmem:[#allocation1 + $0x24] sm:$0xff]  ;;  %v81_v55 = vld [vmem:[#allocation1 + $0x2d] sm:$0xff] }
  0x1a   :  { %451 = vmatpush.bf16.xpose.msra.mxu0 %v252_v37  ;;  %464 = vmatpush.bf16.xpose.msra.mxu1 %v253_v39  ;;  %v82_v56 = vld [vmem:[#allocation1 + $0x36] sm:$0xff]  ;;  %v83_v57 = vld [vmem:[#allocation1 + $0x3f] sm:$0xff] }
  0x1b   :  { %477 = vmatpush.bf16.xpose.msra.mxu2 %v254_v36  ;;  %490 = vmatpush.bf16.xpose.msra.mxu3 %v255_v38  ;;  %85 = vst [vmem:[#allocation1] ss:$9 sm:$0xff] %v32_v58 }
  0x21   :  { %400 = vmatmul.bf16.vlgmr.msrb.gmra.mxu0 %v70_v32  ;;  %413 = vmatmul.bf16.vlgmr.msrb.gmra.mxu1 %v71_v33  ;;  %v271_v32 = vpack.c.b16 %v223_v28, %v223_v28  ;;  %v269_v33 = vpack.c.b16 %v221_v29, %v221_v29 }
  0x22   :  { %503 = vmatpush.bf16.xpose.msrb.mxu0 %v256_v47  ;;  %516 = vmatpush.bf16.xpose.msrb.mxu1 %v257_v52  ;;  %v86_v13 = vld [vmem:[#allocation1] sm:$0xff]  ;;  %v87_v14 = vld [vmem:[#allocation1 + $0x9] sm:$0xff]  ;;  %v88_v15 = vld [vmem:[#allocation1 + $0x12] sm:$0xff] }
  0x23   :  { %v89_v18 = vld [vmem:[#allocation1 + $0x1b] sm:$0xff]  ;;  %v90_v19 = vld [vmem:[#allocation1 + $0x24] sm:$0xff]  ;;  %v91_v20 = vld [vmem:[#allocation1 + $0x2d] sm:$0xff] }
  0x24   :  { %426 = vmatmul.bf16.vlgmr.msrb.gmra.mxu2 %v72_v34  ;;  %439 = vmatmul.bf16.vlgmr.msrb.gmra.mxu3 %v73_v35  ;;  %v92_v21 = vld [vmem:[#allocation1 + $0x36] sm:$0xff]  ;;  %v93_v22 = vld [vmem:[#allocation1 + $0x3f] sm:$0xff] }
  0x25   :  { %529 = vmatpush.bf16.xpose.msrb.mxu2 %v258_v46  ;;  %542 = vmatpush.bf16.xpose.msrb.mxu3 %v259_v51  ;;  %95 = vst [vmem:[#allocation1] ss:$9 sm:$0xff] %v33_v23  ;;  %v51_v34 = vld [vmem:[#allocation2 + $0x78] sm:$0x77]  ;;  %v50_v35 = vld [vmem:[#allocation2 + $0x70] sm:$0x77] }
  0x26   :  { %v226_v36 = vunpack.c.l.b16 %v51_v34  ;;  %v224_v37 = vunpack.c.l.b16 %v50_v35  ;;  %v227_v38 = vunpack.c.h.b16 %v51_v34  ;;  %v225_v39 = vunpack.c.h.b16 %v50_v35  ;;  %v52_v51 = vld [vmem:[#allocation2 + $0x80] sm:$0x77] }
  0x27   :  { %v229_v58 = vunpack.c.h.b16 %v52_v51 }
  0x28   :  { %v274_v40 = vpack.c.b16 %v226_v36, %v226_v36  ;;  %v272_v41 = vpack.c.b16 %v224_v37, %v224_v37  ;;  %v275_v42 = vpack.c.b16 %v227_v38, %v227_v38  ;;  %v273_v43 = vpack.c.b16 %v225_v39, %v225_v39  ;;  %v59_v39 = vld [vmem:[#allocation2 + $0xb8] sm:$0x77] }
  0x29   :  { %v277_v62 = vpack.c.b16 %v229_v58, %v229_v58 }
  0x2c   :  { %v96_v44 = vld [vmem:[#allocation1] sm:$0xff]  ;;  %v97_v45 = vld [vmem:[#allocation1 + $0x9] sm:$0xff]  ;;  %v98_v46 = vld [vmem:[#allocation1 + $0x12] sm:$0xff] }
  0x2d   :  { %v99_v47 = vld [vmem:[#allocation1 + $0x1b] sm:$0xff] }
  0x2e   :  { %v102_v52 = vld [vmem:[#allocation1 + $0x36] sm:$0xff] }
  0x31   :  { %452 = vmatmul.bf16.vlgmr.msra.gmra.mxu0 %v76_v48  ;;  %465 = vmatmul.bf16.vlgmr.msra.gmra.mxu1 %v77_v49  ;;  %v100_v48 = vld [vmem:[#allocation1 + $0x24] sm:$0xff]  ;;  %v101_v49 = vld [vmem:[#allocation1 + $0x2d] sm:$0xff] }
  0x32   :  { %555 = vmatpush.bf16.xpose.msra.mxu0 %v260_v2  ;;  %568 = vmatpush.bf16.xpose.msra.mxu1 %v261_v4  ;;  %v232_v2 = vunpack.c.l.b16 %v54_v0  ;;  %v233_v4 = vunpack.c.h.b16 %v54_v0 }
  0x34   :  { %478 = vmatmul.bf16.vlgmr.msra.gmra.mxu2 %v78_v50  ;;  %491 = vmatmul.bf16.vlgmr.msra.gmra.mxu3 %v79_v53  ;;  %v53_v50 = vld [vmem:[#allocation2 + $0x88] sm:$0x77]  ;;  %v103_v53 = vld [vmem:[#allocation1 + $0x3f] sm:$0xff]  ;;  %v280_v6 = vpack.c.b16 %v232_v2, %v232_v2  ;;  %v281_v8 = vpack.c.b16 %v233_v4, %v233_v4 }
  0x35   :  { %581 = vmatpush.bf16.xpose.msra.mxu2 %v262_v1  ;;  %594 = vmatpush.bf16.xpose.msra.mxu3 %v263_v3  ;;  %v234_v1 = vunpack.c.l.b16 %v55_v63  ;;  %v235_v3 = vunpack.c.h.b16 %v55_v63 }
  0x37   :  { %v282_v5 = vpack.c.b16 %v234_v1, %v234_v1  ;;  %v283_v7 = vpack.c.b16 %v235_v3, %v235_v3 }
  0x41   :  { %504 = vmatmul.bf16.vlgmr.msrb.gmra.mxu0 %v80_v54  ;;  %517 = vmatmul.bf16.vlgmr.msrb.gmra.mxu1 %v81_v55  ;;  %v34_v54 = vld [vmem:[%s1107_s0 + $0x20] sm:$0xff]  ;;  %v230_v55 = vunpack.c.l.b16 %v53_v50 }
  0x42   :  { %607 = vmatpush.bf16.xpose.msrb.mxu0 %v264_v12  ;;  %620 = vmatpush.bf16.xpose.msrb.mxu1 %v265_v17  ;;  %105 = vst [vmem:[#allocation1] ss:$9 sm:$0xff] %v34_v54 }
  0x43   :  { %v278_v59 = vpack.c.b16 %v230_v55, %v230_v55 }
  0x44   :  { %530 = vmatmul.bf16.vlgmr.msrb.gmra.mxu2 %v82_v56  ;;  %543 = vmatmul.bf16.vlgmr.msrb.gmra.mxu3 %v83_v57  ;;  %v228_v56 = vunpack.c.l.b16 %v52_v51  ;;  %v231_v57 = vunpack.c.h.b16 %v53_v50 }
  0x45   :  { %633 = vmatpush.bf16.xpose.msrb.mxu2 %v266_v11  ;;  %646 = vmatpush.bf16.xpose.msrb.mxu3 %v267_v16  ;;  %v56_v16 = vld [vmem:[#allocation2 + $0xa0] sm:$0x77] }
  0x46   :  { %v276_v60 = vpack.c.b16 %v228_v56, %v228_v56  ;;  %v279_v61 = vpack.c.b16 %v231_v57, %v231_v57  ;;  %v237_v24 = vunpack.c.h.b16 %v56_v16 }
  0x49   :  { %v106_v9 = vld [vmem:[#allocation1] sm:$0xff]  ;;  %v107_v10 = vld [vmem:[#allocation1 + $0x9] sm:$0xff]  ;;  %v108_v11 = vld [vmem:[#allocation1 + $0x12] sm:$0xff] }
  0x4a   :  { %v109_v12 = vld [vmem:[#allocation1 + $0x1b] sm:$0xff] }
  0x4b   :  { %v112_v17 = vld [vmem:[#allocation1 + $0x36] sm:$0xff] }
  0x51   :  { %556 = vmatmul.bf16.vlgmr.msra.gmra.mxu0 %v86_v13  ;;  %569 = vmatmul.bf16.vlgmr.msra.gmra.mxu1 %v87_v14  ;;  %v110_v13 = vld [vmem:[#allocation1 + $0x24] sm:$0xff]  ;;  %v111_v14 = vld [vmem:[#allocation1 + $0x2d] sm:$0xff] }
  0x52   :  { %659 = vmatpush.bf16.xpose.msra.mxu0 %v268_v31  ;;  %672 = vmatpush.bf16.xpose.msra.mxu1 %v269_v33  ;;  %v285_v31 = vpack.c.b16 %v237_v24, %v237_v24 }
  0x54   :  { %582 = vmatmul.bf16.vlgmr.msra.gmra.mxu2 %v88_v15  ;;  %595 = vmatmul.bf16.vlgmr.msra.gmra.mxu3 %v89_v18  ;;  %v57_v15 = vld [vmem:[#allocation2 + $0xa8] sm:$0x77]  ;;  %v113_v18 = vld [vmem:[#allocation1 + $0x3f] sm:$0xff] }
  0x55   :  { %685 = vmatpush.bf16.xpose.msra.mxu2 %v270_v30  ;;  %698 = vmatpush.bf16.xpose.msra.mxu3 %v271_v32  ;;  %v239_v23 = vunpack.c.h.b16 %v57_v15 }
  0x57   :  { %v287_v30 = vpack.c.b16 %v239_v23, %v239_v23 }
  0x61   :  { %608 = vmatmul.bf16.vlgmr.msrb.gmra.mxu0 %v90_v19  ;;  %621 = vmatmul.bf16.vlgmr.msrb.gmra.mxu1 %v91_v20  ;;  %v35_v19 = vld [vmem:[%s1107_s0 + $0x28] sm:$0xff]  ;;  %v998_v20 = vld [vmem:[%s1109_s2] ss:$0 sm:$0xff]  ;;  %s1056_s0 = smov [#allocation5]  }
  0x62   :  { %711 = vmatpush.bf16.xpose.msrb.mxu0 %v272_v41  ;;  %724 = vmatpush.bf16.xpose.msrb.mxu1 %v273_v43  ;;  %115 = vst [vmem:[#allocation1] ss:$9 sm:$0xff] %v35_v19  ;;  %v242_v41 = vunpack.c.l.b16 %v59_v39  ;;  %v243_v43 = vunpack.c.h.b16 %v59_v39  ;;  %s984_s2 = sshll.u32 %s1056_s0, 4  ;;  %s985_s2 = int_to_ptr.vmem [resolvable:$true] %s984_s2 }
  0x64   :  { %634 = vmatmul.bf16.vlgmr.msrb.gmra.mxu2 %v92_v21  ;;  %647 = vmatmul.bf16.vlgmr.msrb.gmra.mxu3 %v93_v22  ;;  %v238_v21 = vunpack.c.l.b16 %v57_v15  ;;  %v236_v22 = vunpack.c.l.b16 %v56_v16  ;;  %v290_v50 = vpack.c.b16 %v242_v41, %v242_v41 }
  0x65   :  { %737 = vmatpush.bf16.xpose.msrb.mxu2 %v274_v40  ;;  %750 = vmatpush.bf16.xpose.msrb.mxu3 %v275_v42  ;;  %v58_v40 = vld [vmem:[#allocation2 + $0xb0] sm:$0x77] }
  0x66   :  { %v286_v28 = vpack.c.b16 %v238_v21, %v238_v21  ;;  %v284_v29 = vpack.c.b16 %v236_v22, %v236_v22  ;;  %v240_v42 = vunpack.c.l.b16 %v58_v40 }
  0x68   :  { %v288_v51 = vpack.c.b16 %v240_v42, %v240_v42 }
  0x69   :  { %v116_v1 = vld [vmem:[#allocation1] sm:$0xff]  ;;  %v117_v2 = vld [vmem:[#allocation1 + $0x9] sm:$0xff]  ;;  %v118_v4 = vld [vmem:[#allocation1 + $0x12] sm:$0xff] }
  0x6a   :  { %v123_v21 = vld [vmem:[#allocation1 + $0x3f] sm:$0xff] }
  0x71   :  { %660 = vmatmul.bf16.vlgmr.msra.gmra.mxu0 %v96_v44  ;;  %673 = vmatmul.bf16.vlgmr.msra.gmra.mxu1 %v97_v45  ;;  %v241_v44 = vunpack.c.h.b16 %v58_v40 }
  0x72   :  { %763 = vmatpush.bf16.xpose.msra.mxu0 %v276_v60  ;;  %776 = vmatpush.bf16.xpose.msra.mxu1 %v277_v62 }
  0x74   :  { %686 = vmatmul.bf16.vlgmr.msra.gmra.mxu2 %v98_v46  ;;  %699 = vmatmul.bf16.vlgmr.msra.gmra.mxu3 %v99_v47 }
  0x75   :  { %789 = vmatpush.bf16.xpose.msra.mxu2 %v278_v59  ;;  %802 = vmatpush.bf16.xpose.msra.mxu3 %v279_v61 }
  0x81   :  { %712 = vmatmul.bf16.vlgmr.msrb.gmra.mxu0 %v100_v48  ;;  %725 = vmatmul.bf16.vlgmr.msrb.gmra.mxu1 %v101_v49 }
  0x82   :  { %815 = vmatpush.bf16.xpose.msrb.mxu0 %v280_v6  ;;  %828 = vmatpush.bf16.xpose.msrb.mxu1 %v281_v8 }
  0x84   :  { %738 = vmatmul.bf16.vlgmr.msrb.gmra.mxu2 %v102_v52  ;;  %751 = vmatmul.bf16.vlgmr.msrb.gmra.mxu3 %v103_v53  ;;  %v291_v52 = vpack.c.b16 %v243_v43, %v243_v43  ;;  %v289_v53 = vpack.c.b16 %v241_v44, %v241_v44 }
  0x85   :  { %841 = vmatpush.bf16.xpose.msrb.mxu2 %v282_v5  ;;  %854 = vmatpush.bf16.xpose.msrb.mxu3 %v283_v7  ;;  %v119_v5 = vld [vmem:[#allocation1 + $0x1b] sm:$0xff] }
  0x8e   :  { %v349_v25 = vpop.f32.mrf.mxu0  ;;  %v362_v26 = vpop.f32.mrf.mxu1 }
  0x8f   :  { %v350_v27 = vadd.f32 %v998_v20, %v349_v25  ;;  %v122_v20 = vld [vmem:[#allocation1 + $0x36] sm:$0xff] }
  0x91   :  { %v363_v32 = vadd.f32 %v362_v26, %v350_v27  ;;  %764 = vmatmul.bf16.vlgmr.msra.gmra.mxu0 %v106_v9  ;;  %777 = vmatmul.bf16.vlgmr.msra.gmra.mxu1 %v107_v10 }
  0x92   :  { %867 = vmatpush.bf16.xpose.msra.mxu0 %v284_v29  ;;  %880 = vmatpush.bf16.xpose.msra.mxu1 %v285_v31 }
  0x94   :  { %790 = vmatmul.bf16.vlgmr.msra.gmra.mxu2 %v108_v11  ;;  %803 = vmatmul.bf16.vlgmr.msra.gmra.mxu3 %v109_v12 }
  0x95   :  { %893 = vmatpush.bf16.xpose.msra.mxu2 %v286_v28  ;;  %906 = vmatpush.bf16.xpose.msra.mxu3 %v287_v30 }
  0x96   :  { %v351_v36 = vpop.f32.mrf.mxu0  ;;  %v364_v37 = vpop.f32.mrf.mxu1 }
  0x97   :  { %v375_v33 = vpop.f32.mrf.mxu2  ;;  %v388_v34 = vpop.f32.mrf.mxu3 }
  0x98   :  { %v376_v35 = vadd.f32 %v375_v33, %v363_v32 }
  0x9a   :  { %v389_v38 = vadd.f32 %v388_v34, %v376_v35 }
  0x9e   :  { %v401_v47 = vpop.f32.mrf.mxu0  ;;  %v414_v48 = vpop.f32.mrf.mxu1 }
  0x9f   :  { %v377_v45 = vpop.f32.mrf.mxu2  ;;  %v390_v46 = vpop.f32.mrf.mxu3  ;;  %v402_v49 = vadd.f32 %v401_v47, %v389_v38 }
  0xa1   :  { %v415_v54 = vadd.f32 %v414_v48, %v402_v49  ;;  %816 = vmatmul.bf16.vlgmr.msrb.gmra.mxu0 %v110_v13  ;;  %829 = vmatmul.bf16.vlgmr.msrb.gmra.mxu1 %v111_v14 }
  0xa2   :  { %919 = vmatpush.bf16.xpose.msrb.mxu0 %v288_v51  ;;  %932 = vmatpush.bf16.xpose.msrb.mxu1 %v289_v53 }
  0xa4   :  { %842 = vmatmul.bf16.vlgmr.msrb.gmra.mxu2 %v112_v17  ;;  %855 = vmatmul.bf16.vlgmr.msrb.gmra.mxu3 %v113_v18  ;;  %v120_v17 = vld [vmem:[#allocation1 + $0x24] sm:$0xff]  ;;  %v121_v18 = vld [vmem:[#allocation1 + $0x2d] sm:$0xff] }
  0xa5   :  { %945 = vmatpush.bf16.xpose.msrb.mxu2 %v290_v50  ;;  %958 = vmatpush.bf16.xpose.msrb.mxu3 %v291_v52 }
  0xa6   :  { %v403_v58 = vpop.f32.mrf.mxu0  ;;  %v416_v59 = vpop.f32.mrf.mxu1 }
  0xa7   :  { %v427_v55 = vpop.f32.mrf.mxu2  ;;  %v440_v56 = vpop.f32.mrf.mxu3 }
  0xa8   :  { %v428_v57 = vadd.f32 %v427_v55, %v415_v54 }
  0xaa   :  { %v441_v60 = vadd.f32 %v440_v56, %v428_v57 }
  0xae   :  { %v453_v63 = vpop.f32.mrf.mxu0  ;;  %v466_v0 = vpop.f32.mrf.mxu1 }
  0xaf   :  { %v429_v61 = vpop.f32.mrf.mxu2  ;;  %v442_v62 = vpop.f32.mrf.mxu3  ;;  %v454_v3 = vadd.f32 %v453_v63, %v441_v60 }
  0xb1   :  { %v467_v6 = vadd.f32 %v466_v0, %v454_v3  ;;  %868 = vmatmul.bf16.vlgmr.msra.gmra.mxu0 %v116_v1  ;;  %881 = vmatmul.bf16.vlgmr.msra.gmra.mxu1 %v117_v2 }
  0xb4   :  { %894 = vmatmul.bf16.vlgmr.msra.gmra.mxu2 %v118_v4  ;;  %907 = vmatmul.bf16.vlgmr.msra.gmra.mxu3 %v119_v5 }
  0xb6   :  { %v455_v10 = vpop.f32.mrf.mxu0  ;;  %v468_v11 = vpop.f32.mrf.mxu1 }
  0xb7   :  { %v479_v7 = vpop.f32.mrf.mxu2  ;;  %v492_v8 = vpop.f32.mrf.mxu3 }
  0xb8   :  { %v480_v9 = vadd.f32 %v479_v7, %v467_v6 }
  0xba   :  { %v493_v12 = vadd.f32 %v492_v8, %v480_v9 }
  0xbe   :  { %v505_v15 = vpop.f32.mrf.mxu0  ;;  %v518_v16 = vpop.f32.mrf.mxu1 }
  0xbf   :  { %v481_v13 = vpop.f32.mrf.mxu2  ;;  %v494_v14 = vpop.f32.mrf.mxu3  ;;  %v506_v19 = vadd.f32 %v505_v15, %v493_v12 }
  0xc1   :  { %v519_v22 = vadd.f32 %v518_v16, %v506_v19  ;;  %920 = vmatmul.bf16.vlgmr.msrb.gmra.mxu0 %v120_v17  ;;  %933 = vmatmul.bf16.vlgmr.msrb.gmra.mxu1 %v121_v18 }
  0xc4   :  { %946 = vmatmul.bf16.vlgmr.msrb.gmra.mxu2 %v122_v20  ;;  %959 = vmatmul.bf16.vlgmr.msrb.gmra.mxu3 %v123_v21 }
  0xc6   :  { %v507_v26 = vpop.f32.mrf.mxu0  ;;  %v520_v27 = vpop.f32.mrf.mxu1 }
  0xc7   :  { %v531_v23 = vpop.f32.mrf.mxu2  ;;  %v544_v24 = vpop.f32.mrf.mxu3 }
  0xc8   :  { %v532_v25 = vadd.f32 %v531_v23, %v519_v22 }
  0xca   :  { %v545_v28 = vadd.f32 %v544_v24, %v532_v25 }
  0xce   :  { %v557_v31 = vpop.f32.mrf.mxu0  ;;  %v570_v32 = vpop.f32.mrf.mxu1 }
  0xcf   :  { %v533_v29 = vpop.f32.mrf.mxu2  ;;  %v546_v30 = vpop.f32.mrf.mxu3  ;;  %v558_v45 = vadd.f32 %v557_v31, %v545_v28 }
  0xd1   :  { %v571_v50 = vadd.f32 %v570_v32, %v558_v45 }
  0xd6   :  { %v559_v35 = vpop.f32.mrf.mxu0  ;;  %v572_v36 = vpop.f32.mrf.mxu1 }
  0xd7   :  { %v583_v33 = vpop.f32.mrf.mxu2  ;;  %v596_v34 = vpop.f32.mrf.mxu3 }
  0xd8   :  { %v584_v51 = vadd.f32 %v583_v33, %v571_v50 }
  0xda   :  { %v597_v54 = vadd.f32 %v596_v34, %v584_v51 }
  0xde   :  { %v609_v39 = vpop.f32.mrf.mxu0  ;;  %v622_v40 = vpop.f32.mrf.mxu1 }
  0xdf   :  { %v585_v37 = vpop.f32.mrf.mxu2  ;;  %v598_v38 = vpop.f32.mrf.mxu3  ;;  %v610_v57 = vadd.f32 %v609_v39, %v597_v54 }
  0xe1   :  { %v623_v58 = vadd.f32 %v622_v40, %v610_v57 }
  0xe6   :  { %v611_v43 = vpop.f32.mrf.mxu0  ;;  %v624_v44 = vpop.f32.mrf.mxu1 }
  0xe7   :  { %v635_v41 = vpop.f32.mrf.mxu2  ;;  %v648_v42 = vpop.f32.mrf.mxu3 }
  0xe8   :  { %v636_v61 = vadd.f32 %v635_v41, %v623_v58 }
  0xea   :  { %v649_v0 = vadd.f32 %v648_v42, %v636_v61 }
  0xee   :  { %v661_v48 = vpop.f32.mrf.mxu0  ;;  %v674_v49 = vpop.f32.mrf.mxu1 }
  0xef   :  { %v637_v46 = vpop.f32.mrf.mxu2  ;;  %v650_v47 = vpop.f32.mrf.mxu3  ;;  %v662_v1 = vadd.f32 %v661_v48, %v649_v0 }
  0xf1   :  { %v675_v6 = vadd.f32 %v674_v49, %v662_v1 }
  0xf6   :  { %v663_v55 = vpop.f32.mrf.mxu0  ;;  %v676_v56 = vpop.f32.mrf.mxu1 }
  0xf7   :  { %v687_v52 = vpop.f32.mrf.mxu2  ;;  %v700_v53 = vpop.f32.mrf.mxu3 }
  0xf8   :  { %v688_v7 = vadd.f32 %v687_v52, %v675_v6 }
  0xfa   :  { %v701_v10 = vadd.f32 %v700_v53, %v688_v7 }
  0xfe   :  { %v713_v62 = vpop.f32.mrf.mxu0  ;;  %v726_v63 = vpop.f32.mrf.mxu1 }
  0xff   :  { %v689_v59 = vpop.f32.mrf.mxu2  ;;  %v702_v60 = vpop.f32.mrf.mxu3  ;;  %v714_v13 = vadd.f32 %v713_v62, %v701_v10 }
 0x101   :  { %v727_v14 = vadd.f32 %v726_v63, %v714_v13 }
 0x106   :  { %v715_v4 = vpop.f32.mrf.mxu0  ;;  %v728_v5 = vpop.f32.mrf.mxu1 }
 0x107   :  { %v739_v2 = vpop.f32.mrf.mxu2  ;;  %v752_v3 = vpop.f32.mrf.mxu3 }
 0x108   :  { %v740_v17 = vadd.f32 %v739_v2, %v727_v14 }
 0x10a   :  { %v753_v20 = vadd.f32 %v752_v3, %v740_v17 }
 0x10e   :  { %v765_v11 = vpop.f32.mrf.mxu0  ;;  %v778_v12 = vpop.f32.mrf.mxu1 }
 0x10f   :  { %v741_v8 = vpop.f32.mrf.mxu2  ;;  %v754_v9 = vpop.f32.mrf.mxu3  ;;  %v766_v21 = vadd.f32 %v765_v11, %v753_v20 }
 0x111   :  { %v779_v26 = vadd.f32 %v778_v12, %v766_v21 }
 0x116   :  { %v767_v18 = vpop.f32.mrf.mxu0  ;;  %v780_v19 = vpop.f32.mrf.mxu1 }
 0x117   :  { %v791_v15 = vpop.f32.mrf.mxu2  ;;  %v804_v16 = vpop.f32.mrf.mxu3 }
 0x118   :  { %v792_v27 = vadd.f32 %v791_v15, %v779_v26 }
 0x11a   :  { %v805_v30 = vadd.f32 %v804_v16, %v792_v27 }
 0x11e   :  { %v817_v24 = vpop.f32.mrf.mxu0  ;;  %v830_v25 = vpop.f32.mrf.mxu1 }
 0x11f   :  { %v793_v22 = vpop.f32.mrf.mxu2  ;;  %v806_v23 = vpop.f32.mrf.mxu3  ;;  %v818_v33 = vadd.f32 %v817_v24, %v805_v30 }
 0x121   :  { %v831_v34 = vadd.f32 %v830_v25, %v818_v33 }
 0x126   :  { %v819_v31 = vpop.f32.mrf.mxu0  ;;  %v832_v32 = vpop.f32.mrf.mxu1 }
 0x127   :  { %v843_v28 = vpop.f32.mrf.mxu2  ;;  %v856_v29 = vpop.f32.mrf.mxu3 }
 0x128   :  { %v844_v37 = vadd.f32 %v843_v28, %v831_v34 }
 0x12a   :  { %v857_v40 = vadd.f32 %v856_v29, %v844_v37 }
 0x12e   :  { %v869_v38 = vpop.f32.mrf.mxu0  ;;  %v882_v39 = vpop.f32.mrf.mxu1 }
 0x12f   :  { %v845_v35 = vpop.f32.mrf.mxu2  ;;  %v858_v36 = vpop.f32.mrf.mxu3  ;;  %v870_v41 = vadd.f32 %v869_v38, %v857_v40 }
 0x131   :  { %v883_v46 = vadd.f32 %v882_v39, %v870_v41 }
 0x136   :  { %v871_v44 = vpop.f32.mrf.mxu0  ;;  %v884_v45 = vpop.f32.mrf.mxu1 }
 0x137   :  { %v895_v42 = vpop.f32.mrf.mxu2  ;;  %v908_v43 = vpop.f32.mrf.mxu3 }
 0x138   :  { %v896_v47 = vadd.f32 %v895_v42, %v883_v46 }
 0x13a   :  { %v909_v50 = vadd.f32 %v908_v43, %v896_v47 }
 0x13e   :  { %v921_v51 = vpop.f32.mrf.mxu0  ;;  %v934_v52 = vpop.f32.mrf.mxu1 }
 0x13f   :  { %v897_v48 = vpop.f32.mrf.mxu2  ;;  %v910_v49 = vpop.f32.mrf.mxu3  ;;  %v922_v53 = vadd.f32 %v921_v51, %v909_v50 }
 0x141   :  { %v935_v54 = vadd.f32 %v934_v52, %v922_v53 }
 0x146   :  { %v923_v58 = vpop.f32.mrf.mxu0  ;;  %v936_v59 = vpop.f32.mrf.mxu1 }
 0x147   :  { %v947_v55 = vpop.f32.mrf.mxu2  ;;  %v960_v56 = vpop.f32.mrf.mxu3 }
 0x148   :  { %v948_v57 = vadd.f32 %v947_v55, %v935_v54 }
 0x14a   :  { %v961_v60 = vadd.f32 %v960_v56, %v948_v57 }
 0x14c   :  { %v965_v61 = vsel %vm964_vm0, %v961_v60, -inf }
 0x14d   :  { %966 = vmax.xlane.f32.xlu0 %v965_v61 }
 0x14f   :  { %v949_v62 = vpop.f32.mrf.mxu2  ;;  %v962_v63 = vpop.f32.mrf.mxu3 }
 0x1c0   :  { %v967_v0 = vpop.xlane.xlu0 %966 }
 0x1c1   :  { %v968_v1 = vsub.f32 %v961_v60, %v967_v0 }
 0x1c3   :  { %v969_v2 = vmul.f32 1.442695, %v968_v1 }
 0x1c5   :  { %999 = vpow2.f32 %v969_v2 }
 0x1cb   :  { %v1000_v3 = vpop.eup %999 }
 0x1cc   :  { %v971_v4 = vsel %vm964_vm0, %v1000_v3, 0.0 }
 0x1cd   :  { %972 = vadd.xlane.f32.xlu0 %v971_v4 }
 0x240   :  { %v973_v5 = vpop.xlane.xlu0 %972 }
 0x241   :  { %1001 = vlog2.f32 %v973_v5 }
 0x247   :  { %v1002_v6 = vpop.eup %1001 }
 0x248   :  { %v975_v7 = vmul.f32 0.6931472, %v1002_v6 }
 0x24a   :  { %v976_v8 = vadd.f32 %v975_v7, %v967_v0 }
 0x24c   :  { %v977_v9 = vsub.f32 %v961_v60, %v976_v8 }
 0x24e   :  { %978 = vst.msk [vmem:[#allocation5] sm:$0x3] %vm964_vm0, %v977_v9 }
 0x24f   :  { %989 = dma.vmem_to_hbm [thread:$0]  %s985_s2, 32, %s987_s5, [#allocation4]  }
 0x250   :  { %1053 = dma.done.wait [#allocation4], 32  }
 0x251   :  { %1054 = vsyncadd [#allocation4], 4294967264 }
 0x252   :  { %994 = vsyncpa [#allocation3], 1 }
 0x253   :  { %995 = vsyncpa [#allocation4], 1 }

</bundles_post_ra>
